<compile_context>
chip_gen: v7x
topology: tpu7x:2x2x1
jax: 0.10.0
libtpu: 0.0.40
codegen_flags: <defaults>
</compile_context>

<pallas_src>
import math
import functools

import jax
import jax.numpy as jnp
from jax import lax
from jax.experimental import pallas as pl
from jax.experimental.pallas import tpu as pltpu


def _hash_bits_i31(shape, seed_i32):
    """Uniform pseudo-random ints in [0, 2^31) from a counter-based hash.

    Uses only int32 wrap-around arithmetic, xor and logical shifts, which
    lower cleanly on both Mosaic (TPU VPU) and interpret mode.
    """
    r = lax.broadcasted_iota(jnp.int32, shape, 0)
    c = lax.broadcasted_iota(jnp.int32, shape, 1)
    # Weyl-style index mixing + murmur3-ish finalizer (two's-complement wrap).
    x = seed_i32 + r * jnp.int32(-1640531527) + c * jnp.int32(40503)
    x = x ^ lax.shift_right_logical(x, 16)
    x = x * jnp.int32(-2048144789)          # 0x85EBCA6B
    x = x ^ lax.shift_right_logical(x, 13)
    x = x * jnp.int32(-1028477387)          # 0xC2B2AE35
    x = x ^ lax.shift_right_logical(x, 16)
    return x & jnp.int32(0x7FFFFFFF)        # drop sign bit -> [0, 2^31)


def _ffn_kernel(dropout_prob, seed_ref, x_ref, w1_ref, b1_ref, w2_ref, b2_ref, o_ref):
    # x_ref: (TM, Hp) bf16, w*_ref: (Hp, Hp) bf16, b*_ref: (1, Hp) f32
    x = x_ref[...]

    # fc1 + bias + relu   (bf16 MXU matmul, f32 accumulate)
    h = jnp.dot(x, w1_ref[...], preferred_element_type=jnp.float32) + b1_ref[...]
    h = jnp.maximum(h, 0.0)

    # dropout (training semantics: keep w.p. 1-p, scale kept values by 1/(1-p)).
    # Mask depends on (seed, tile index, in-tile position), not PyTorch's RNG.
    if dropout_prob > 0.0:
        seed = seed_ref[0] + pl.program_id(0) * jnp.int32(1000003)
        bits = _hash_bits_i31(h.shape, seed)
        thresh = jnp.int32(min(int(dropout_prob * 2147483648.0), 2147483647))
        scale = 1.0 / (1.0 - dropout_prob)          # folded Python constant
        h = jnp.where(bits >= thresh, h * scale, 0.0)

    # fc2 + bias   (cast the f32 intermediate back to bf16 for the MXU)
    y = jnp.dot(h.astype(w2_ref.dtype), w2_ref[...],
                preferred_element_type=jnp.float32) + b2_ref[...]
    o_ref[...] = y.astype(o_ref.dtype)


def _pad2d(a, rows, cols, dtype):
    a = a.astype(dtype)
    if a.shape == (rows, cols):
        return a
    return jnp.zeros((rows, cols), dtype).at[:a.shape[0], :a.shape[1]].set(a)


def positionwise_ffn(x, w1, b1, w2, b2, *, dropout_prob=0.0, seed=0,
                     block_rows=256, matmul_dtype=jnp.bfloat16):
    """x: (M, H) float32; w1, w2: (H, H) stored (in, out); b1, b2: (1, H)."""
    M, H = x.shape
    # Row tile: multiple of 8 (sublane), capped at block_rows; lanes padded to 128.
    TM = min(block_rows, pl.cdiv(M, 8) * 8)
    Mp = pl.cdiv(M, TM) * TM
    Hp = pl.cdiv(H, 128) * 128

    # Padded / cast operands (zero padding is exact: padded cols contribute 0).
    xp = _pad2d(x, Mp, Hp, matmul_dtype)
    w1p = _pad2d(w1, Hp, Hp, matmul_dtype)
    w2p = _pad2d(w2, Hp, Hp, matmul_dtype)
    b1p = _pad2d(b1, 1, Hp, jnp.float32)
    b2p = _pad2d(b2, 1, Hp, jnp.float32)
    seed_arr = jnp.asarray([seed], dtype=jnp.int32)

    wbytes = jnp.dtype(matmul_dtype).itemsize
    # Default double-buffering of every operand + output tile.
    vmem_needed = 2 * (2 * Hp * Hp * wbytes + 2 * Hp * 4
                       + TM * Hp * wbytes + TM * Hp * 4)
    vmem_limit = int(min(max(vmem_needed + (8 << 20), 32 << 20), 64 << 20))

    cost = pl.CostEstimate(
        flops=4 * Mp * Hp * Hp,            # two M*H*H matmuls
        transcendentals=0,
        bytes_accessed=int(Mp * Hp * wbytes + Mp * Hp * 4
                           + 2 * Hp * Hp * wbytes + 2 * Hp * 4),
    )

    kernel = functools.partial(_ffn_kernel, float(dropout_prob))

    out = pl.pallas_call(
        kernel,
        out_shape=jax.ShapeDtypeStruct((Mp, Hp), jnp.float32),
        grid_spec=pltpu.PrefetchScalarGridSpec(
            num_scalar_prefetch=1,                     # seed -> SMEM
            grid=(Mp // TM,),
            in_specs=[
                pl.BlockSpec((TM, Hp), lambda i, s: (i, 0)),   # x row tile
                pl.BlockSpec((Hp, Hp), lambda i, s: (0, 0)),   # W1 (resident)
                pl.BlockSpec((1, Hp), lambda i, s: (0, 0)),    # b1
                pl.BlockSpec((Hp, Hp), lambda i, s: (0, 0)),   # W2 (resident)
                pl.BlockSpec((1, Hp), lambda i, s: (0, 0)),    # b2
            ],
            out_specs=pl.BlockSpec((TM, Hp), lambda i, s: (i, 0)),
        ),
        compiler_params=pltpu.CompilerParams(
            dimension_semantics=("parallel",),         # row tiles are independent
            vmem_limit_bytes=vmem_limit,
        ),
        cost_estimate=cost,
    )(seed_arr, xp, w1p, b1p, w2p, b2p)

    return out[:M, :H]


def init_params(key, hidden_size):
    """Kaiming-normal weights (fan_in mode, gain=sqrt(2)), zero biases."""
    k1, k2 = jax.random.split(key)
    std = math.sqrt(2.0 / hidden_size)
    # PyTorch weight is (out, in); generate then transpose to (in, out).
    w1 = (jax.random.normal(k1, (hidden_size, hidden_size), jnp.float32) * std).T
    w2 = (jax.random.normal(k2, (hidden_size, hidden_size), jnp.float32) * std).T
    b1 = jnp.zeros((1, hidden_size), jnp.float32)
    b2 = jnp.zeros((1, hidden_size), jnp.float32)
    return w1, b1, w2, b2


if __name__ == "__main__":
    key = jax.random.PRNGKey(0)
    batch, seq, hidden = 2, 8, 32

    kx, kp = jax.random.split(key)
    x = jax.random.normal(kx, (batch, seq, hidden), jnp.float32)
    w1, b1, w2, b2 = init_params(kp, hidden)

    x2d = x.reshape(batch * seq, hidden)

    # Eval-mode forward (dropout off) -> compare against a pure-JAX reference
    # that uses the same bf16-matmul / f32-accumulate numerics.
    out2d = positionwise_ffn(x2d, w1, b1, w2, b2, dropout_prob=0.0, seed=0)
    out = out2d.reshape(batch, seq, hidden)
    jax.block_until_ready(out)

    xb = x2d.astype(jnp.bfloat16)
    w1b = w1.astype(jnp.bfloat16)
    w2b = w2.astype(jnp.bfloat16)
    h_ref = jnp.maximum(jnp.dot(xb, w1b, preferred_element_type=jnp.float32) + b1, 0.0)
    ref = jnp.dot(h_ref.astype(jnp.bfloat16), w2b,
                  preferred_element_type=jnp.float32) + b2
    assert jnp.allclose(out2d, ref, atol=2e-2, rtol=2e-2), "mismatch vs reference"

    # Exercise the in-kernel hash-based dropout path (train-mode); smoke test.
    out_do = positionwise_ffn(x2d, w1, b1, w2, b2, dropout_prob=0.5, seed=123)
    jax.block_until_ready(out_do)
    assert out_do.shape == x2d.shape
    assert bool(jnp.all(jnp.isfinite(out_do)))

    print("KERNEL_OK")
</pallas_src>

<mosaic_0001>
module attributes {stable_mosaic.version = 11 : i64} {
  func.func @_ffn_kernel(%arg0: i32, %arg1: memref<1xi32, #tpu.memory_space<smem>>, %arg2: memref<16x128xbf16, #tpu.memory_space<vmem>>, %arg3: memref<128x128xbf16, #tpu.memory_space<vmem>>, %arg4: memref<1x128xf32, #tpu.memory_space<vmem>>, %arg5: memref<128x128xbf16, #tpu.memory_space<vmem>>, %arg6: memref<1x128xf32, #tpu.memory_space<vmem>>, %arg7: memref<16x128xf32, #tpu.memory_space<vmem>>) attributes {dimension_semantics = [#tpu.dimension_semantics<parallel>], iteration_bounds = array<i64: 1>, scalar_prefetch = 1 : i64, scratch_operands = 0 : i64, tpu.core_type = #tpu.core_type<tc>, window_params = [{transform_indices = @transform_0, window_bounds = array<i64: 16, 128>}, {pipeline_mode = #tpu.pipeline_mode<synchronous>, transform_indices = @transform_1, window_bounds = array<i64: 128, 128>}, {pipeline_mode = #tpu.pipeline_mode<synchronous>, transform_indices = @transform_2, window_bounds = array<i64: 1, 128>}, {pipeline_mode = #tpu.pipeline_mode<synchronous>, transform_indices = @transform_3, window_bounds = array<i64: 128, 128>}, {pipeline_mode = #tpu.pipeline_mode<synchronous>, transform_indices = @transform_4, window_bounds = array<i64: 1, 128>}, {transform_indices = @transform_5, window_bounds = array<i64: 16, 128>}]} {
    %c0 = arith.constant 0 : index
    %c0_0 = arith.constant 0 : index
    %0 = vector.load %arg2[%c0, %c0_0] : memref<16x128xbf16, #tpu.memory_space<vmem>>, vector<16x128xbf16>
    %c0_1 = arith.constant 0 : index
    %c0_2 = arith.constant 0 : index
    %1 = vector.load %arg3[%c0_1, %c0_2] : memref<128x128xbf16, #tpu.memory_space<vmem>>, vector<128x128xbf16>
    %cst = arith.constant dense<0.000000e+00> : vector<16x128xf32>
    %2 = tpu.matmul %0, %1, %cst {dimension_numbers = #tpu.dot_dimension_numbers<[1], [0], [0], [1], [0, 0, 1, 1], [], []>} : vector<16x128xbf16>, vector<128x128xbf16>, vector<16x128xf32> -> vector<16x128xf32>
    %c0_3 = arith.constant 0 : index
    %c0_4 = arith.constant 0 : index
    %3 = vector.load %arg4[%c0_3, %c0_4] : memref<1x128xf32, #tpu.memory_space<vmem>>, vector<1x128xf32>
    %4 = vector.broadcast %3 : vector<1x128xf32> to vector<16x128xf32>
    %5 = arith.addf %2, %4 : vector<16x128xf32>
    %cst_5 = arith.constant 0.000000e+00 : f32
    %6 = vector.broadcast %cst_5 : f32 to vector<16x128xf32>
    %7 = arith.maximumf %5, %6 : vector<16x128xf32>
    %8 = arith.truncf %7 : vector<16x128xf32> to vector<16x128xbf16>
    %c0_6 = arith.constant 0 : index
    %c0_7 = arith.constant 0 : index
    %9 = vector.load %arg5[%c0_6, %c0_7] : memref<128x128xbf16, #tpu.memory_space<vmem>>, vector<128x128xbf16>
    %cst_8 = arith.constant dense<0.000000e+00> : vector<16x128xf32>
    %10 = tpu.matmul %8, %9, %cst_8 {dimension_numbers = #tpu.dot_dimension_numbers<[1], [0], [0], [1], [0, 0, 1, 1], [], []>} : vector<16x128xbf16>, vector<128x128xbf16>, vector<16x128xf32> -> vector<16x128xf32>
    %c0_9 = arith.constant 0 : index
    %c0_10 = arith.constant 0 : index
    %11 = vector.load %arg6[%c0_9, %c0_10] : memref<1x128xf32, #tpu.memory_space<vmem>>, vector<1x128xf32>
    %12 = vector.broadcast %11 : vector<1x128xf32> to vector<16x128xf32>
    %13 = arith.addf %10, %12 : vector<16x128xf32>
    %c0_11 = arith.constant 0 : index
    %c0_12 = arith.constant 0 : index
    %14 = vector.load %arg7[%c0_11, %c0_12] : memref<16x128xf32, #tpu.memory_space<vmem>>, vector<16x128xf32>
    tpu.vector_store %arg7[%c0_11, %c0_12], %13 {strides = array<i32>} : memref<16x128xf32, #tpu.memory_space<vmem>>, vector<16x128xf32>,
    return
  }
  func.func @transform_0(%arg0: i32, %arg1: memref<1xi32, #tpu.memory_space<smem>>) -> (i32, i32) {
    %c0_i32 = arith.constant 0 : i32
    %c0_i32_0 = arith.constant 0 : i32
    return %arg0, %c0_i32 : i32, i32
  }
  func.func @transform_1(%arg0: i32, %arg1: memref<1xi32, #tpu.memory_space<smem>>) -> (i32, i32) {
    %c0_i32 = arith.constant 0 : i32
    %c0_i32_0 = arith.constant 0 : i32
    %c0_i32_1 = arith.constant 0 : i32
    return %c0_i32, %c0_i32_0 : i32, i32
  }
  func.func @transform_2(%arg0: i32, %arg1: memref<1xi32, #tpu.memory_space<smem>>) -> (i32, i32) {
    %c0_i32 = arith.constant 0 : i32
    %c0_i32_0 = arith.constant 0 : i32
    %c0_i32_1 = arith.constant 0 : i32
    return %c0_i32, %c0_i32_0 : i32, i32
  }
  func.func @transform_3(%arg0: i32, %arg1: memref<1xi32, #tpu.memory_space<smem>>) -> (i32, i32) {
    %c0_i32 = arith.constant 0 : i32
    %c0_i32_0 = arith.constant 0 : i32
    %c0_i32_1 = arith.constant 0 : i32
    return %c0_i32, %c0_i32_0 : i32, i32
  }
  func.func @transform_4(%arg0: i32, %arg1: memref<1xi32, #tpu.memory_space<smem>>) -> (i32, i32) {
    %c0_i32 = arith.constant 0 : i32
    %c0_i32_0 = arith.constant 0 : i32
    %c0_i32_1 = arith.constant 0 : i32
    return %c0_i32, %c0_i32_0 : i32, i32
  }
  func.func @transform_5(%arg0: i32, %arg1: memref<1xi32, #tpu.memory_space<smem>>) -> (i32, i32) {
    %c0_i32 = arith.constant 0 : i32
    %c0_i32_0 = arith.constant 0 : i32
    return %arg0, %c0_i32 : i32, i32
  }
}

</mosaic_0001>

<bundles_post_ra>
// kernel: tpu_custom_call.1
= control target key start
LH: loop header
LB: loop body
LE: loop exit
PB: predicated region body
PF: predicated region fallthrough
CT: control target
= control target key end

     0   :  { %12 = vsyncpa [#allocation5], 0  ;;  %s633_s0 = inlined_call_operand.<no memory space> [shape: s32[1], index: 0, kind: input, shape index: {}]   ;;  %s634_s1 = inlined_call_operand.hbm [shape: bf16[16,128], index: 1, kind: input, shape index: {}]   ;;  %s635_s2 = inlined_call_operand.hbm [shape: bf16[128,128], index: 2, kind: input, shape index: {}]   ;;  %s636_s3 = inlined_call_operand.vmem [shape: f32[1,128], index: 3, kind: input, shape index: {}]   ;;  %s637_s4 = inlined_call_operand.hbm [shape: bf16[128,128], index: 4, kind: input, shape index: {}]   ;;  %s638_s5 = inlined_call_operand.vmem [shape: f32[1,128], index: 5, kind: input, shape index: {}]   ;;  %s639_s6 = inlined_call_operand.hbm [shape: f32[16,128], index: 6, kind: output, shape index: {}]  }
   0x1   :  { %13 = vsyncpa [#allocation8], 0 }
   0x2   :  { %14 = vsyncpa [#allocation6], 0  ;;  %s518_s0 = smov [#allocation7]   ;;  %s519_s22 = smov [#allocation4]  }
   0x3   :  { %s32_s21 = sshll.u32 %s518_s0, 4  ;;  %s20_s23 = sshll.u32 %s519_s22, 4  ;;  %s33_s21 = int_to_ptr.vmem [resolvable:$true] %s32_s21  ;;  %s563_s23 = int_to_ptr.vmem [resolvable:$true] %s20_s23 }
   0x4   :  { %s424_s26 = scalar_lea.hbm %s635_s2, 1024 }
   0x5   :  { %p425_p0 = scmp.ne.s32.totalorder %s635_s2, %s424_s26  ;;  %p428_p1 = scmp.lt.u32.totalorder %s424_s26, %s635_s2 }
   0x7   :  { %p430_p2 = pnand %p428_p1, %p425_p0 }
   0x9   :  { %433 = shalt.err (!%p430_p2)
}
   0xa   :  { %s434_s7 = scalar_lea.vmem %s33_s21, 1024  ;;  %p439_p4 = scmp.lt.s32.totalorder %s33_s21, %s33_s21 }
   0xb   :  { %p435_p3 = scmp.ne.s32.totalorder %s33_s21, %s434_s7  ;;  %p440_p5 = scmp.lt.s32.totalorder %s434_s7, %s434_s7 }
   0xd   :  { %p441_p6 = por %p440_p5, %p439_p4 }
   0xf   :  { %p442_p7 = pnand %p441_p6, %p435_p3 }
  0x11   :  { %445 = shalt.err (!%p442_p7)
}
  0x12   :  { %s520_s8 = smov 64   ;;  %s521_s9 = smov 4  }
  0x13   :  { %38 = dma.hbm_to_vmem [thread:$0]  %s635_s2, 1024, %s33_s21, [#allocation8], %s520_s8, %s520_s8, %s521_s9  }
  0x14   :  { %s446_s14 = scalar_lea.hbm %s634_s1, 128 }
  0x15   :  { %p447_p8 = scmp.ne.s32.totalorder %s634_s1, %s446_s14  ;;  %p450_p9 = scmp.lt.u32.totalorder %s446_s14, %s634_s1 }
  0x17   :  { %p452_p10 = pnand %p450_p9, %p447_p8 }
  0x19   :  { %455 = shalt.err (!%p452_p10)
}
  0x1a   :  { %s456_s19 = scalar_lea.vmem %s563_s23, 128  ;;  %p461_p12 = scmp.lt.s32.totalorder %s563_s23, %s563_s23 }
  0x1b   :  { %p457_p11 = scmp.ne.s32.totalorder %s563_s23, %s456_s19  ;;  %p462_p13 = scmp.lt.s32.totalorder %s456_s19, %s456_s19 }
  0x1d   :  { %p463_p0 = por %p462_p13, %p461_p12 }
  0x1f   :  { %p464_p1 = pnand %p463_p0, %p457_p11 }
  0x21   :  { %467 = shalt.err (!%p464_p1)
}
  0x22   :  { %26 = dma.hbm_to_vmem [thread:$0]  %s634_s1, 128, %s563_s23, [#allocation5], %s520_s8, %s520_s8, %s521_s9  }
  0x23   :  { %s522_s0 = smov [#allocation9]   ;;  %s468_s25 = scalar_lea.hbm %s637_s4, 1024 }
  0x24   :  { %s46_s21 = sshll.u32 %s522_s0, 4  ;;  %p469_p2 = scmp.ne.s32.totalorder %s637_s4, %s468_s25  ;;  %s47_s21 = int_to_ptr.vmem [resolvable:$true] %s46_s21 }
  0x25   :  { %p472_p3 = scmp.lt.u32.totalorder %s468_s25, %s637_s4 }
  0x27   :  { %p474_p4 = pnand %p472_p3, %p469_p2 }
  0x29   :  { %477 = shalt.err (!%p474_p4)
}
  0x2a   :  { %s478_s30 = scalar_lea.vmem %s47_s21, 1024  ;;  %p483_p6 = scmp.lt.s32.totalorder %s47_s21, %s47_s21 }
  0x2b   :  { %p479_p5 = scmp.ne.s32.totalorder %s47_s21, %s478_s30  ;;  %p484_p7 = scmp.lt.s32.totalorder %s478_s30, %s478_s30 }
  0x2d   :  { %p485_p8 = por %p484_p7, %p483_p6 }
  0x2f   :  { %p486_p9 = pnand %p485_p8, %p479_p5 }
  0x31   :  { %489 = shalt.err (!%p486_p9)
}
  0x32   :  { %52 = dma.hbm_to_vmem [thread:$0]  %s637_s4, 1024, %s47_s21, [#allocation8], %s520_s8, %s520_s8, %s521_s9  }
  0x33   :  { %512 = dma.done.wait [#allocation5], 128  }
  0x34   :  { %513 = vsyncadd [#allocation5], 4294967168 }
  0x35   :  { %514 = dma.done.wait [#allocation8], 2048  }
  0x36   :  { %515 = vsyncadd [#allocation8], 4294965248  ;;  %v523_v0 = vmov 0.0   ;;  %vm524_vm0 = vmmov 0   ;;  %v407_v1 = vld [vmem:[#allocation7] sm:$0xff]   ;;  %v408_v2 = vld [vmem:[#allocation7 + $0x8] sm:$0xff]  }
  0x37   :  { %357 = vmatprep.subr.bf16.mxu0 %v523_v0  ;;  %373 = vmatprep.mubr.msk.bf16.mxu0 %vm524_vm0, %v523_v0  ;;  %v409_v3 = vld [vmem:[#allocation7 + $0x10] sm:$0xff]   ;;  %v416_v4 = vld [vmem:[#allocation9] sm:$0xff]   ;;  %v410_v5 = vld [vmem:[#allocation7 + $0x18] sm:$0xff]   ;;  %s525_s10 = smov [#allocation10]  }
  0x38   :  { %377 = vmatprep.subr.bf16.mxu1 %v523_v0  ;;  %393 = vmatprep.mubr.msk.bf16.mxu1 %vm524_vm0, %v523_v0  ;;  %v417_v6 = vld [vmem:[#allocation9 + $0x8] sm:$0xff]   ;;  %v411_v7 = vld [vmem:[#allocation7 + $0x20] sm:$0xff]   ;;  %v418_v8 = vld [vmem:[#allocation9 + $0x10] sm:$0xff]   ;;  %s307_s11 = sshll.u32 %s525_s10, 4  ;;  %s308_s11 = int_to_ptr.vmem [resolvable:$true] %s307_s11 }
  0x39   :  { %358 = vmatpush3.bf16.msra.mxu0 %v407_v1  ;;  %378 = vmatpush3.bf16.msra.mxu1 %v416_v4  ;;  %v412_v9 = vld [vmem:[#allocation7 + $0x28] sm:$0xff]   ;;  %v419_v10 = vld [vmem:[#allocation9 + $0x18] sm:$0xff]   ;;  %v413_v11 = vld [vmem:[#allocation7 + $0x30] sm:$0xff]   ;;  %p495_p11 = scmp.lt.s32.totalorder %s308_s11, %s308_s11 }
  0x3a   :  { %359 = vmatprep.subr.bf16.mxu0 %v523_v0  ;;  %379 = vmatprep.subr.bf16.mxu1 %v523_v0  ;;  %v420_v12 = vld [vmem:[#allocation9 + $0x20] sm:$0xff]   ;;  %v414_v13 = vld [vmem:[#allocation7 + $0x38] sm:$0xff]   ;;  %v421_v14 = vld [vmem:[#allocation9 + $0x28] sm:$0xff]  }
  0x3b   :  { %v415_v15 = vld [vmem:[#allocation4] sm:$0xff]   ;;  %v422_v16 = vld [vmem:[#allocation9 + $0x30] sm:$0xff]  }
  0x3c   :  { %v423_v17 = vld [vmem:[#allocation9 + $0x38] sm:$0xff]  }
  0x3d   :  { %360 = vmatpush3.bf16.msra.mxu0 %v408_v2  ;;  %380 = vmatpush3.bf16.msra.mxu1 %v417_v6  ;;  %v320_v18 = vld [vmem:[%s636_s3] ss:$0 sm:$0xff]  ;;  %s490_s3 = scalar_lea.vmem %s308_s11, 256 }
  0x3e   :  { %361 = vmatprep.subr.bf16.mxu0 %v523_v0  ;;  %381 = vmatprep.subr.bf16.mxu1 %v523_v0  ;;  %v330_v28 = vld [vmem:[%s638_s5] ss:$0 sm:$0xff]  ;;  %p491_p10 = scmp.ne.s32.totalorder %s308_s11, %s490_s3  ;;  %p496_p12 = scmp.lt.s32.totalorder %s490_s3, %s490_s3 }
  0x40   :  { %p497_p13 = por %p496_p12, %p495_p11 }
  0x41   :  { %362 = vmatpush3.bf16.msra.mxu0 %v409_v3  ;;  %382 = vmatpush3.bf16.msra.mxu1 %v418_v8 }
  0x42   :  { %363 = vmatprep.subr.bf16.mxu0 %v523_v0  ;;  %383 = vmatprep.subr.bf16.mxu1 %v523_v0  ;;  %p498_p0 = pnand %p497_p13, %p491_p10 }
  0x45   :  { %364 = vmatpush3.bf16.msra.mxu0 %v410_v5  ;;  %384 = vmatpush3.bf16.msra.mxu1 %v419_v10 }
  0x46   :  { %365 = vmatprep.subr.bf16.mxu0 %v523_v0  ;;  %385 = vmatprep.subr.bf16.mxu1 %v523_v0 }
  0x49   :  { %366 = vmatpush3.bf16.msra.mxu0 %v411_v7  ;;  %386 = vmatpush3.bf16.msra.mxu1 %v420_v12 }
  0x4a   :  { %367 = vmatprep.subr.bf16.mxu0 %v523_v0  ;;  %387 = vmatprep.subr.bf16.mxu1 %v523_v0 }
  0x4d   :  { %368 = vmatpush3.bf16.msra.mxu0 %v412_v9  ;;  %388 = vmatpush3.bf16.msra.mxu1 %v421_v14 }
  0x4e   :  { %369 = vmatprep.subr.bf16.mxu0 %v523_v0  ;;  %389 = vmatprep.subr.bf16.mxu1 %v523_v0 }
  0x51   :  { %370 = vmatpush3.bf16.msra.mxu0 %v413_v11  ;;  %390 = vmatpush3.bf16.msra.mxu1 %v422_v16 }
  0x52   :  { %371 = vmatprep.subr.bf16.mxu0 %v523_v0  ;;  %391 = vmatprep.subr.bf16.mxu1 %v523_v0 }
  0x55   :  { %372 = vmatpush3.bf16.msra.mxu0 %v414_v13  ;;  %392 = vmatpush3.bf16.msra.mxu1 %v423_v17 }
  0x58   :  { %374 = vmatmul.mubr.bf16.vlgmr.msra.gmra.mrb[0].mxu0 %v415_v15 }
 0x12b   :  { %v178_v19 = vpop.f32.mrb[0].mxu0 }
 0x12c   :  { %v179_v20 = vadd.f32 %v320_v18, %v178_v19  ;;  %v375_v21 = vpop.f32.mrb[1].mxu0 }
 0x12d   :  { %v181_v22 = vpop.f32.mrb[2].mxu0 }
 0x12e   :  { %v182_v23 = vadd.f32 %v320_v18, %v181_v22  ;;  %v376_v24 = vpop.f32.mrb[3].mxu0  ;;  %v185_v25 = vmax.f32 %v179_v20, 0.0 }
 0x130   :  { %v186_v26 = vmax.f32 %v182_v23, 0.0 }
 0x132   :  { %v187_v27 = vpack.c.bf16 %v186_v26, %v185_v25 }
 0x134   :  { %394 = vmatmul.mubr.bf16.vlgmr.msra.gmra.mrb[0].mxu1 %v187_v27 }
 0x207   :  { %v293_v29 = vpop.f32.mrb[0].mxu1 }
 0x208   :  { %v294_v30 = vadd.f32 %v330_v28, %v293_v29  ;;  %v395_v31 = vpop.f32.mrb[1].mxu1 }
 0x209   :  { %v296_v32 = vpop.f32.mrb[2].mxu1 }
 0x20a   :  { %300 = vst [vmem:[#allocation10] sm:$0xff] %v294_v30  ;;  %v297_v33 = vadd.f32 %v330_v28, %v296_v32  ;;  %v396_v34 = vpop.f32.mrb[3].mxu1 }
 0x20c   :  { %301 = vst [vmem:[#allocation10 + $0x8] sm:$0xff] %v297_v33 }
 0x20d   :  { %501 = shalt.err (!%p498_p0)
}
 0x20e   :  { %s502_s13 = scalar_lea.hbm %s639_s6, 256 }
 0x20f   :  { %p503_p1 = scmp.ne.s32.totalorder %s639_s6, %s502_s13  ;;  %p506_p2 = scmp.lt.u32.totalorder %s502_s13, %s639_s6 }
 0x211   :  { %p508_p3 = pnand %p506_p2, %p503_p1 }
 0x213   :  { %511 = shalt.err (!%p508_p3)
}
 0x214   :  { %s526_s18 = smov 128   ;;  %s527_s19 = smov 8  }
 0x215   :  { %313 = dma.vmem_to_hbm [thread:$0]  %s308_s11, 256, %s639_s6, [#allocation6], %s526_s18, %s526_s18, %s527_s19  }
 0x216   :  { %516 = dma.done.wait [#allocation6], 256  }
 0x217   :  { %517 = vsyncadd [#allocation6], 4294967040 }
 0x218   :  { %317 = vsyncpa [#allocation5], 1 }
 0x219   :  { %318 = vsyncpa [#allocation8], 1 }
 0x21a   :  { %319 = vsyncpa [#allocation6], 1 }

</bundles_post_ra>
